<compile_context>
chip_gen: v7x
topology: tpu7x:2x2x1
jax: 0.10.0
libtpu: 0.0.40
codegen_flags: <defaults>
</compile_context>

<pallas_src>
import functools

import jax
import jax.numpy as jnp
from jax.experimental import pallas as pl
from jax.experimental.pallas import tpu as pltpu


def _round_up(n, m):
    return ((n + m - 1) // m) * m


def attention_mech_kernel(x_ref, w1t_ref, w2t_ref, b_ref, o_ref):
    """Linear -> ReLU -> Linear -> Softmax(dim=1) for one batch tile.

    x_ref:   (TB, D)   matmul dtype (bf16)  -- contraction dim unpadded
    w1t_ref: (D,  Dp)  matmul dtype, pre-transposed (in x out), zero-padded out cols
    w2t_ref: (Dp, Dp)  matmul dtype, pre-transposed, zero-padded
    b_ref:   (2,  Dp)  f32; row 0 = b1 (zero-padded), row 1 = b2 (-1e30 on padded lanes)
    o_ref:   (TB, Dp)  output dtype (= x.dtype)
    """
    x = x_ref[...]
    b1 = b_ref[0:1, :]
    b2 = b_ref[1:2, :]

    # Linear 1: x @ W1^T (weights pre-transposed in the wrapper -> plain (M,K)x(K,N)).
    h = jax.lax.dot_general(
        x, w1t_ref[...],
        dimension_numbers=(((1,), (0,)), ((), ())),
        preferred_element_type=jnp.float32,
    ) + b1
    h = jnp.maximum(h, 0.0)                      # ReLU, f32 epilogue

    # Linear 2.
    z = jax.lax.dot_general(
        h.astype(w2t_ref.dtype), w2t_ref[...],
        dimension_numbers=(((1,), (0,)), ((), ())),
        preferred_element_type=jnp.float32,
    ) + b2

    # Numerically stable softmax over the feature (lane) axis.  Padded lanes carry
    # z = -1e30 -> exp underflows to exactly 0, so they never win the row max nor add
    # to the sum.  Exact division (NOT approx reciprocal) so rows sum to 1 within f32
    # rounding.
    m = jnp.max(z, axis=-1, keepdims=True)
    e = jnp.exp(z - m)
    s = jnp.sum(e, axis=-1, keepdims=True)
    o_ref[...] = (e / s).astype(o_ref.dtype)


def prepare_params(w1, b1, w2, b2, *, matmul_dtype=jnp.bfloat16):
    """One-time layout plumbing: transpose to (in, out), pad the output/lane dim to a
    multiple of 128, mask padded softmax lanes via b2 = -1e30, cast weights to bf16."""
    D = w1.shape[0]
    Dp = _round_up(max(D, 128), 128)
    f32 = jnp.float32
    w1t = jnp.zeros((D, Dp), matmul_dtype).at[:, :D].set(w1.T.astype(matmul_dtype))
    w2t = jnp.zeros((Dp, Dp), matmul_dtype).at[:D, :D].set(w2.T.astype(matmul_dtype))
    b1p = jnp.zeros((Dp,), f32).at[:D].set(b1.astype(f32))
    b2p = jnp.full((Dp,), -1e30, f32).at[:D].set(b2.astype(f32))
    bias = jnp.stack([b1p, b2p], axis=0)          # (2, Dp) f32
    return w1t, w2t, bias


@functools.partial(jax.jit, static_argnames=("tb_max",))
def attention_mechanism(x, w1t, w2t, bias, *, tb_max=256):
    """x: (B, D). w1t/w2t/bias from prepare_params(). Returns (B, D) in x.dtype."""
    B, D = x.shape
    Dp = w1t.shape[1]
    md = w1t.dtype
    out_dtype = x.dtype

    # Batch tiling: round only to the sublane quantum (8); guarantee >= 2 tiles whenever
    # Bp >= 16 (both v7x TensorCores busy); never round Bp up to a full multiple of 256
    # (waste is at most TB - 8 rows).
    Bp = _round_up(max(B, 8), 8)
    if Bp >= 16:
        TB = min(tb_max, _round_up((Bp + 1) // 2, 8))
    else:
        TB = Bp
    grid_b = (Bp + TB - 1) // TB
    Bp = grid_b * TB

    # Build the padded input directly in the matmul dtype (fuses under jit).  The
    # contraction dim stays at D (no lane padding of x) -- the MXU handles K < 128.
    xp = jnp.zeros((Bp, D), md).at[:B, :].set(x.astype(md))

    itemsize = jnp.dtype(md).itemsize
    out_itemsize = jnp.dtype(out_dtype).itemsize
    # Resident single-buffered weights/bias + double-buffered x/out + f32 intermediates.
    vmem_est = ((D * Dp + Dp * Dp) * itemsize + 2 * Dp * 4
                + 2 * TB * D * itemsize + 2 * TB * Dp * out_itemsize
                + 4 * TB * Dp * 4)
    vmem_limit = max(16 << 20, min(64 << 20, 2 * vmem_est))

    cost = pl.CostEstimate(
        flops=2 * Bp * D * Dp + 2 * Bp * Dp * Dp,
        transcendentals=Bp * Dp,
        bytes_accessed=(Bp * D * itemsize
                        + (D * Dp + Dp * Dp) * itemsize
                        + 2 * Dp * 4
                        + Bp * Dp * out_itemsize),
    )

    out = pl.pallas_call(
        attention_mech_kernel,
        out_shape=jax.ShapeDtypeStruct((Bp, Dp), out_dtype),
        grid=(grid_b,),
        in_specs=[
            # x: tiled over batch, default double-buffering for the pipeline.
            pl.BlockSpec((TB, D), lambda i: (i, 0)),
            # Weights/bias: resident across batch tiles, single buffer (no re-DMA,
            # no pointless second buffer).
            pl.BlockSpec((D, Dp), lambda i: (0, 0), pipeline_mode=pl.Buffered(1)),
            pl.BlockSpec((Dp, Dp), lambda i: (0, 0), pipeline_mode=pl.Buffered(1)),
            pl.BlockSpec((2, Dp), lambda i: (0, 0), pipeline_mode=pl.Buffered(1)),
        ],
        out_specs=pl.BlockSpec((TB, Dp), lambda i: (i, 0)),
        compiler_params=pltpu.CompilerParams(
            dimension_semantics=("parallel",),   # batch tiles shard across TCs (v7x)
            vmem_limit_bytes=int(vmem_limit),
        ),
        cost_estimate=cost,
    )(xp, w1t, w2t, bias)

    return out[:B, :D]


def reference(x, w1, b1, w2, b2):
    h = jnp.maximum(x @ w1.T + b1, 0.0)
    z = h @ w2.T + b2
    return jax.nn.softmax(z, axis=1)


if __name__ == "__main__":
    B = 8          # batch
    D = 32         # embed_dim

    key = jax.random.PRNGKey(0)
    kx, kw1, kb1, kw2, kb2 = jax.random.split(key, 5)

    x = jax.random.normal(kx, (B, D), dtype=jnp.float32)

    # Deterministic "Kaiming-uniform-like" init matching nn.Linear shapes (out, in).
    bound = 1.0 / (D ** 0.5)
    w1 = jax.random.uniform(kw1, (D, D), jnp.float32, -bound, bound)
    b1 = jax.random.uniform(kb1, (D,), jnp.float32, -bound, bound)
    w2 = jax.random.uniform(kw2, (D, D), jnp.float32, -bound, bound)
    b2 = jax.random.uniform(kb2, (D,), jnp.float32, -bound, bound)

    # One-time parameter plumbing, outside the per-call path.
    w1t, w2t, bias = prepare_params(w1, b1, w2, b2)

    out = attention_mechanism(x, w1t, w2t, bias)
    out = jax.block_until_ready(out)

    ref = reference(x, w1, b1, w2, b2)
    assert out.shape == (B, D)
    # bf16 matmul operands -> slightly looser tolerance than pure f32.
    assert jnp.allclose(out, ref, atol=5e-3, rtol=1e-2), "mismatch vs reference"
    # Exact-division softmax: rows sum to 1 over the real feature lanes.
    assert jnp.allclose(jnp.sum(out, axis=1), 1.0, atol=1e-3), "softmax rows do not sum to 1"

    print("KERNEL_OK")
</pallas_src>

<mosaic_0001>
module attributes {stable_mosaic.version = 11 : i64} {
  func.func @attention_mech_kernel(%arg0: i32, %arg1: memref<8x32xbf16, #tpu.memory_space<vmem>>, %arg2: memref<32x128xbf16, #tpu.memory_space<vmem>>, %arg3: memref<128x128xbf16, #tpu.memory_space<vmem>>, %arg4: memref<2x128xf32, #tpu.memory_space<vmem>>, %arg5: memref<8x128xf32, #tpu.memory_space<vmem>>) attributes {dimension_semantics = [#tpu.dimension_semantics<parallel>], iteration_bounds = array<i64: 1>, scalar_prefetch = 0 : i64, scratch_operands = 0 : i64, tpu.core_type = #tpu.core_type<tc>, window_params = [{transform_indices = @transform_0, window_bounds = array<i64: 8, 32>}, {pipeline_mode = #tpu.pipeline_mode<synchronous>, transform_indices = @transform_1, window_bounds = array<i64: 32, 128>}, {pipeline_mode = #tpu.pipeline_mode<synchronous>, transform_indices = @transform_2, window_bounds = array<i64: 128, 128>}, {pipeline_mode = #tpu.pipeline_mode<synchronous>, transform_indices = @transform_3, window_bounds = array<i64: 2, 128>}, {transform_indices = @transform_4, window_bounds = array<i64: 8, 128>}]} {
    %c0 = arith.constant 0 : index
    %c0_0 = arith.constant 0 : index
    %0 = vector.load %arg1[%c0, %c0_0] : memref<8x32xbf16, #tpu.memory_space<vmem>>, vector<8x32xbf16>
    %c0_1 = arith.constant 0 : index
    %c0_2 = arith.constant 0 : index
    %1 = vector.load %arg4[%c0_1, %c0_2] : memref<2x128xf32, #tpu.memory_space<vmem>>, vector<1x128xf32>
    %c1 = arith.constant 1 : index
    %c0_3 = arith.constant 0 : index
    %2 = vector.load %arg4[%c1, %c0_3] : memref<2x128xf32, #tpu.memory_space<vmem>>, vector<1x128xf32>
    %c0_4 = arith.constant 0 : index
    %c0_5 = arith.constant 0 : index
    %3 = vector.load %arg2[%c0_4, %c0_5] : memref<32x128xbf16, #tpu.memory_space<vmem>>, vector<32x128xbf16>
    %cst = arith.constant dense<0.000000e+00> : vector<8x128xf32>
    %4 = tpu.matmul %0, %3, %cst {dimension_numbers = #tpu.dot_dimension_numbers<[1], [0], [0], [1], [0, 0, 1, 1], [], []>} : vector<8x32xbf16>, vector<32x128xbf16>, vector<8x128xf32> -> vector<8x128xf32>
    %5 = vector.broadcast %1 : vector<1x128xf32> to vector<8x128xf32>
    %6 = arith.addf %4, %5 : vector<8x128xf32>
    %cst_6 = arith.constant 0.000000e+00 : f32
    %7 = vector.broadcast %cst_6 : f32 to vector<8x128xf32>
    %8 = arith.maximumf %6, %7 : vector<8x128xf32>
    %9 = arith.truncf %8 : vector<8x128xf32> to vector<8x128xbf16>
    %c0_7 = arith.constant 0 : index
    %c0_8 = arith.constant 0 : index
    %10 = vector.load %arg3[%c0_7, %c0_8] : memref<128x128xbf16, #tpu.memory_space<vmem>>, vector<128x128xbf16>
    %cst_9 = arith.constant dense<0.000000e+00> : vector<8x128xf32>
    %11 = tpu.matmul %9, %10, %cst_9 {dimension_numbers = #tpu.dot_dimension_numbers<[1], [0], [0], [1], [0, 0, 1, 1], [], []>} : vector<8x128xbf16>, vector<128x128xbf16>, vector<8x128xf32> -> vector<8x128xf32>
    %12 = vector.broadcast %2 : vector<1x128xf32> to vector<8x128xf32>
    %13 = arith.addf %11, %12 : vector<8x128xf32>
    %cst_10 = arith.constant dense<0xFF800000> : vector<8xf32>
    %14 = vector.multi_reduction <maximumf>, %13, %cst_10 [1] : vector<8x128xf32> to vector<8xf32>
    %15 = vector.shape_cast %14 : vector<8xf32> to vector<8x1xf32>
    %16 = vector.broadcast %15 : vector<8x1xf32> to vector<8x128xf32>
    %17 = arith.subf %13, %16 : vector<8x128xf32>
    %18 = math.exp %17 : vector<8x128xf32>
    %cst_11 = arith.constant dense<0.000000e+00> : vector<8xf32>
    %19 = vector.multi_reduction <add>, %18, %cst_11 [1] : vector<8x128xf32> to vector<8xf32>
    %20 = vector.shape_cast %19 : vector<8xf32> to vector<8x1xf32>
    %21 = vector.broadcast %20 : vector<8x1xf32> to vector<8x128xf32>
    %22 = arith.divf %18, %21 : vector<8x128xf32>
    %c0_12 = arith.constant 0 : index
    %c0_13 = arith.constant 0 : index
    %23 = vector.load %arg5[%c0_12, %c0_13] : memref<8x128xf32, #tpu.memory_space<vmem>>, vector<8x128xf32>
    tpu.vector_store %arg5[%c0_12, %c0_13], %22 {strides = array<i32>} : memref<8x128xf32, #tpu.memory_space<vmem>>, vector<8x128xf32>,
    return
  }
  func.func @transform_0(%arg0: i32) -> (i32, i32) {
    %c0_i32 = arith.constant 0 : i32
    %c0_i32_0 = arith.constant 0 : i32
    return %arg0, %c0_i32 : i32, i32
  }
  func.func @transform_1(%arg0: i32) -> (i32, i32) {
    %c0_i32 = arith.constant 0 : i32
    %c0_i32_0 = arith.constant 0 : i32
    %c0_i32_1 = arith.constant 0 : i32
    return %c0_i32, %c0_i32_0 : i32, i32
  }
  func.func @transform_2(%arg0: i32) -> (i32, i32) {
    %c0_i32 = arith.constant 0 : i32
    %c0_i32_0 = arith.constant 0 : i32
    %c0_i32_1 = arith.constant 0 : i32
    return %c0_i32, %c0_i32_0 : i32, i32
  }
  func.func @transform_3(%arg0: i32) -> (i32, i32) {
    %c0_i32 = arith.constant 0 : i32
    %c0_i32_0 = arith.constant 0 : i32
    %c0_i32_1 = arith.constant 0 : i32
    return %c0_i32, %c0_i32_0 : i32, i32
  }
  func.func @transform_4(%arg0: i32) -> (i32, i32) {
    %c0_i32 = arith.constant 0 : i32
    %c0_i32_0 = arith.constant 0 : i32
    return %arg0, %c0_i32 : i32, i32
  }
}

</mosaic_0001>

<bundles_post_ra>
// kernel: attention_mechanism.1
= control target key start
LH: loop header
LB: loop body
LE: loop exit
PB: predicated region body
PF: predicated region fallthrough
CT: control target
= control target key end

     0   :  { %9 = vsyncpa [#allocation3], 0  ;;  %s473_s0 = inlined_call_operand.vmem [shape: bf16[8,32], index: 0, kind: input, shape index: {}]   ;;  %s474_s1 = inlined_call_operand.hbm [shape: bf16[32,128], index: 1, kind: input, shape index: {}]   ;;  %s475_s2 = inlined_call_operand.hbm [shape: bf16[128,128], index: 2, kind: input, shape index: {}]   ;;  %s476_s3 = inlined_call_operand.vmem [shape: f32[2,128], index: 3, kind: input, shape index: {}]   ;;  %s477_s4 = inlined_call_operand.hbm [shape: f32[8,128], index: 4, kind: output, shape index: {}]  }
   0x1   :  { %10 = vsyncpa [#allocation6], 0 }
   0x2   :  { %11 = vsyncpa [#allocation4], 0  ;;  %s396_s15 = smov [#allocation2]   ;;  %s324_s19 = scalar_lea.hbm %s474_s1, 256 }
   0x3   :  { %s19_s16 = sshll.u32 %s396_s15, 4  ;;  %p325_p0 = scmp.ne.s32.totalorder %s474_s1, %s324_s19  ;;  %s20_s16 = int_to_ptr.vmem [resolvable:$true] %s19_s16 }
   0x4   :  { %p328_p1 = scmp.lt.u32.totalorder %s324_s19, %s474_s1 }
   0x6   :  { %p330_p2 = pnand %p328_p1, %p325_p0 }
   0x8   :  { %333 = shalt.err (!%p330_p2)
}
   0x9   :  { %s334_s24 = scalar_lea.vmem %s20_s16, 256  ;;  %p339_p4 = scmp.lt.s32.totalorder %s20_s16, %s20_s16 }
   0xa   :  { %p335_p3 = scmp.ne.s32.totalorder %s20_s16, %s334_s24  ;;  %p340_p5 = scmp.lt.s32.totalorder %s334_s24, %s334_s24 }
   0xc   :  { %p341_p6 = por %p340_p5, %p339_p4 }
   0xe   :  { %p342_p7 = pnand %p341_p6, %p335_p3 }
  0x10   :  { %345 = shalt.err (!%p342_p7)
}
  0x11   :  { %s397_s25 = smov 64   ;;  %s398_s26 = smov 4  }
  0x12   :  { %25 = dma.hbm_to_vmem [thread:$0]  %s474_s1, 256, %s20_s16, [#allocation3], %s397_s25, %s397_s25, %s398_s26  }
  0x13   :  { %s399_s29 = smov [#allocation5]   ;;  %s346_s7 = scalar_lea.hbm %s475_s2, 1024 }
  0x14   :  { %s31_s30 = sshll.u32 %s399_s29, 4  ;;  %p347_p8 = scmp.ne.s32.totalorder %s475_s2, %s346_s7  ;;  %s32_s30 = int_to_ptr.vmem [resolvable:$true] %s31_s30 }
  0x15   :  { %p350_p9 = scmp.lt.u32.totalorder %s346_s7, %s475_s2 }
  0x17   :  { %p352_p10 = pnand %p350_p9, %p347_p8 }
  0x19   :  { %355 = shalt.err (!%p352_p10)
}
  0x1a   :  { %s356_s12 = scalar_lea.vmem %s32_s30, 1024  ;;  %p361_p12 = scmp.lt.s32.totalorder %s32_s30, %s32_s30 }
  0x1b   :  { %p357_p11 = scmp.ne.s32.totalorder %s32_s30, %s356_s12  ;;  %p362_p13 = scmp.lt.s32.totalorder %s356_s12, %s356_s12 }
  0x1d   :  { %p363_p0 = por %p362_p13, %p361_p12 }
  0x1f   :  { %p364_p1 = pnand %p363_p0, %p357_p11 }
  0x21   :  { %367 = shalt.err (!%p364_p1)
}
  0x22   :  { %37 = dma.hbm_to_vmem [thread:$0]  %s475_s2, 1024, %s32_s30, [#allocation6], %s397_s25, %s397_s25, %s398_s26  }
  0x23   :  { %390 = dma.done.wait [#allocation3], 256  }
  0x24   :  { %391 = vsyncadd [#allocation3], 4294967040 }
  0x25   :  { %392 = dma.done.wait [#allocation6], 1024  }
  0x26   :  { %393 = vsyncadd [#allocation6], 4294966272  ;;  %v400_v0 = vmov 0.0   ;;  %vm401_vm0 = vmmov 0   ;;  %v310_v1 = vld [vmem:[#allocation2] sm:$0xff]   ;;  %v311_v2 = vld [vmem:[#allocation2 + $0x8] sm:$0xff]  }
  0x27   :  { %275 = vmatprep.subr.bf16.mxu0 %v400_v0  ;;  %279 = vmatprep.mubr.msk.bf16.mxu0 %vm401_vm0, %v400_v0  ;;  %v312_v3 = vld [vmem:[#allocation5] sm:$0xff]   ;;  %vm70_vm1 = vcmask 261120   ;;  %v313_v4 = vld [vmem:[#allocation5 + $0x8] sm:$0xff]   ;;  %v314_v6 = vld [vmem:[#allocation5 + $0x10] sm:$0xff]   ;;  %s402_s18 = smov [#allocation7]  }
  0x28   :  { %283 = vmatprep.subr.bf16.mxu1 %v400_v0  ;;  %299 = vmatprep.mubr.msk.bf16.mxu1 %vm401_vm0, %v400_v0  ;;  %v47_v5 = vld [vmem:[%s473_s0] sm:$0xf]  ;;  %v315_v7 = vld [vmem:[#allocation5 + $0x18] sm:$0xff]   ;;  %v316_v8 = vld [vmem:[#allocation5 + $0x20] sm:$0xff]   ;;  %s240_s19 = sshll.u32 %s402_s18, 4  ;;  %s241_s19 = int_to_ptr.vmem [resolvable:$true] %s240_s19 }
  0x29   :  { %276 = vmatpush3.bf16.msra.mxu0 %v310_v1  ;;  %284 = vmatpush3.bf16.msra.mxu1 %v312_v3  ;;  %v317_v9 = vld [vmem:[#allocation5 + $0x28] sm:$0xff]   ;;  %v318_v10 = vld [vmem:[#allocation5 + $0x30] sm:$0xff]   ;;  %v319_v11 = vld [vmem:[#allocation5 + $0x38] sm:$0xff]   ;;  %p373_p3 = scmp.lt.s32.totalorder %s241_s19, %s241_s19 }
  0x2a   :  { %277 = vmatprep.subr.bf16.mxu0 %v400_v0  ;;  %285 = vmatprep.subr.bf16.mxu1 %v400_v0  ;;  %v250_v12 = vld [vmem:[%s476_s3] ss:$0 sm:$0xff]  ;;  %v254_v20 = vld [vmem:[%s476_s3 + $0x1] ss:$0 sm:$0xff]  ;;  %s368_s3 = scalar_lea.vmem %s241_s19, 128 }
  0x2b   :  { %p369_p2 = scmp.ne.s32.totalorder %s241_s19, %s368_s3  ;;  %p374_p4 = scmp.lt.s32.totalorder %s368_s3, %s368_s3 }
  0x2d   :  { %278 = vmatpush3.bf16.msra.mxu0 %v311_v2  ;;  %286 = vmatpush3.bf16.msra.mxu1 %v313_v4  ;;  %p375_p5 = por %p374_p4, %p373_p3 }
  0x2e   :  { %287 = vmatprep.subr.bf16.mxu1 %v400_v0 }
  0x2f   :  { %p376_p6 = pnand %p375_p5, %p369_p2 }
  0x30   :  { %280 = vmatmul.mubr.msk.bf16.vlgmr.msra.gmra.mrb[0].mxu0 %vm70_vm1, %v47_v5 }
  0x31   :  { %288 = vmatpush3.bf16.msra.mxu1 %v314_v6 }
  0x32   :  { %289 = vmatprep.subr.bf16.mxu1 %v400_v0 }
  0x35   :  { %290 = vmatpush3.bf16.msra.mxu1 %v315_v7 }
  0x36   :  { %291 = vmatprep.subr.bf16.mxu1 %v400_v0 }
  0x39   :  { %292 = vmatpush3.bf16.msra.mxu1 %v316_v8 }
  0x3a   :  { %293 = vmatprep.subr.bf16.mxu1 %v400_v0 }
  0x3d   :  { %294 = vmatpush3.bf16.msra.mxu1 %v317_v9 }
  0x3e   :  { %295 = vmatprep.subr.bf16.mxu1 %v400_v0 }
  0x41   :  { %296 = vmatpush3.bf16.msra.mxu1 %v318_v10 }
  0x42   :  { %297 = vmatprep.subr.bf16.mxu1 %v400_v0 }
  0x45   :  { %298 = vmatpush3.bf16.msra.mxu1 %v319_v11 }
 0x103   :  { %v108_v13 = vpop.f32.mrb[0].mxu0 }
 0x104   :  { %v109_v14 = vadd.f32 %v250_v12, %v108_v13  ;;  %v281_v15 = vpop.f32.mrb[1].mxu0 }
 0x105   :  { %v111_v16 = vpop.f32.mrb[2].mxu0 }
 0x106   :  { %v114_v17 = vmax.f32 %v109_v14, 0.0  ;;  %v282_v18 = vpop.f32.mrb[3].mxu0 }
 0x108   :  { %v115_v19 = vpack.c.bf16 %v114_v17, %v114_v17 }
 0x10a   :  { %300 = vmatmul.mubr.bf16.vlgmr.msra.gmra.mrb[0].mxu1 %v115_v19 }
 0x1dd   :  { %v218_v21 = vpop.f32.mrb[0].mxu1 }
 0x1de   :  { %v219_v22 = vadd.f32 %v254_v20, %v218_v21  ;;  %v301_v23 = vpop.f32.mrb[1].mxu1 }
 0x1df   :  { %v221_v24 = vpop.f32.mrb[2].mxu1 }
 0x1e0   :  { %224 = vmax.xlane.f32.xlu0 %v219_v22  ;;  %v302_v25 = vpop.f32.mrb[3].mxu1 }
 0x26d   :  { %v225_v26 = vpop.xlane.xlu0 %224 }
 0x26e   :  { %v226_v27 = vsub.f32 %v219_v22, %v225_v26 }
 0x270   :  { %v227_v28 = vmul.f32 1.442695, %v226_v27 }
 0x272   :  { %320 = vpow2.f32 %v227_v28 }
 0x27c   :  { %v321_v29 = vpop.eup %320 }
 0x27d   :  { %229 = vadd.xlane.f32.xlu0 %v321_v29 }
 0x30a   :  { %v230_v30 = vpop.xlane.xlu0 %229 }
 0x30b   :  { %322 = vrcp.f32 %v230_v30 }
 0x315   :  { %v323_v31 = vpop.eup %322 }
 0x316   :  { %v232_v32 = vmul.f32 %v323_v31, %v321_v29 }
 0x318   :  { %233 = vst [vmem:[#allocation7] sm:$0xff] %v232_v32 }
 0x319   :  { %379 = shalt.err (!%p376_p6)
}
 0x31a   :  { %s380_s22 = scalar_lea.hbm %s477_s4, 128 }
 0x31b   :  { %p381_p7 = scmp.ne.s32.totalorder %s477_s4, %s380_s22  ;;  %p384_p8 = scmp.lt.u32.totalorder %s380_s22, %s477_s4 }
 0x31d   :  { %p386_p9 = pnand %p384_p8, %p381_p7 }
 0x31f   :  { %389 = shalt.err (!%p386_p9)
}
 0x320   :  { %243 = dma.vmem_to_hbm [thread:$0]  %s241_s19, 128, %s477_s4, [#allocation4]  }
 0x321   :  { %394 = dma.done.wait [#allocation4], 128  }
 0x322   :  { %395 = vsyncadd [#allocation4], 4294967168 }
 0x323   :  { %247 = vsyncpa [#allocation3], 1 }
 0x324   :  { %248 = vsyncpa [#allocation6], 1 }
 0x325   :  { %249 = vsyncpa [#allocation4], 1 }

</bundles_post_ra>
